<compile_context>
chip_gen: v7x
topology: tpu7x:2x2x1
jax: 0.10.0
libtpu: 0.0.40
codegen_flags: <defaults>
</compile_context>

<pallas_src>
import jax
import jax.numpy as jnp
from jax.experimental import pallas as pl
from jax.experimental.pallas import tpu as pltpu


def diffusionnet_block_kernel(
    spec_ref,   # [1, C, K]    diffused spectral coefficients (compute dtype)
    feat_ref,   # [1, C, TV]   feat^T vertex tile (input dtype, f32) — residual + MLP
    ops_ref,    # [1, K, 3*TV] fused [evecs^T | (gradX@evecs)^T | (gradY@evecs)^T] tile
    ax_ref,     # [2C, C]      [A_re^T; A_re^T]
    ay_ref,     # [2C, C]      [-A_im^T; A_im^T]
    w0_ref,     # [H, 3C]      fused first MLP layer (over channel concat)
    b0_ref,     # [H, 1]
    w1_ref,     # [C, H]
    b1_ref,     # [C, 1]
    out_ref,    # [1, C, TV]
):
    C = out_ref.shape[1]
    tv = out_ref.shape[2]
    cdt = ops_ref.dtype   # streaming/matmul dtype (bf16 or f32)

    # --- diffusion synthesis + both spatial gradients: ONE fused MXU call ---
    syn = jnp.dot(spec_ref[0], ops_ref[0],
                  preferred_element_type=jnp.float32)       # [C, 3*TV] f32
    fdT = syn[:, :tv]                                        # diffused features^T
    fgxT = syn[:, tv:2 * tv]                                 # gradX features^T
    fgyT = syn[:, 2 * tv:]                                   # gradY features^T

    # --- SpatialGradientFeatures (with_gradient_rotations=True) ---
    #   [re_b; im_b] = [A_re^T;A_re^T] @ fgx + [-A_im^T;A_im^T] @ fgy
    b_cat = (jnp.dot(ax_ref[...], fgxT.astype(cdt), preferred_element_type=jnp.float32)
             + jnp.dot(ay_ref[...], fgyT.astype(cdt), preferred_element_type=jnp.float32))
    feat_grad = jnp.tanh(fgxT * b_cat[:C] + fgyT * b_cat[C:])   # [C, TV] f32

    featT = feat_ref[0]                                      # [C, TV] f32

    # --- MiniMLP([3C, H, C]); fused first layer over the channel concat ---
    comb = jnp.concatenate(
        [featT.astype(cdt), fdT.astype(cdt), feat_grad.astype(cdt)], axis=0)  # [3C, TV]
    h = jnp.dot(w0_ref[...], comb, preferred_element_type=jnp.float32) + b0_ref[...]
    h = jnp.maximum(h, 0.0)                                  # ReLU
    # TODO(synk): nn.Dropout(p=0.5) before the last linear is identity in eval mode.
    y = jnp.dot(w1_ref[...], h.astype(cdt), preferred_element_type=jnp.float32) + b1_ref[...]

    # residual connection (f32)
    out_ref[0] = (y + featT.astype(jnp.float32)).astype(out_ref.dtype)


def _vmem_limit_bytes():
    """Per-generation VMEM scoped limit with headroom (96 MiB on 128-MiB chips,
    48 MiB on 64-MiB v7x). Falls back to 64 MiB if the query fails."""
    try:
        info = pltpu.get_tpu_info()
        cap = getattr(info, "vmem_capacity_bytes", None)
        if cap:
            return int(min(cap - 16 * 1024 * 1024, cap * 3 // 4))
    except Exception:
        pass
    return 64 * 1024 * 1024


def diffusionnet_block(feat, mass, evals, evecs, gradX, gradY, params,
                       *, compute_dtype=jnp.bfloat16, tv=None):
    B, V, C = feat.shape
    K = evals.shape[-1]
    H = params["b0"].shape[-1]

    if tv is None:
        tv = next((c for c in (1024, 512, 256, 128) if V % c == 0), V)
    assert V % tv == 0, "V must be divisible by the vertex tile size"
    nv = V // tv

    prec = jax.lax.Precision.HIGHEST
    f32 = jnp.float32

    # ---- spectral analysis hoisted out of the kernel (once per batch, f32) ----
    t = jnp.maximum(params["diffusion_time"].astype(f32), 1e-8)               # [C]
    xm = feat.astype(f32) * mass[..., None].astype(f32)                        # feat * mass
    spec0 = jnp.einsum("bvk,bvc->bck", evecs.astype(f32), xm, precision=prec)  # [B, C, K]
    coefs = jnp.exp(-evals[:, None, :].astype(f32) * t[None, :, None])         # [B, C, K]
    spec = (coefs * spec0).astype(compute_dtype)

    # ---- per-mesh spectral operators (reusable), fused per-tile [K, 3*tv] slab ----
    GXeT = jnp.einsum("bvw,bwk->bkv", gradX, evecs, precision=prec)            # [B, K, V]
    GYeT = jnp.einsum("bvw,bwk->bkv", gradY, evecs, precision=prec)            # [B, K, V]
    evecsT = jnp.swapaxes(evecs, -1, -2)                                       # [B, K, V]
    ops = jnp.stack([evecsT.reshape(B, K, nv, tv),
                     GXeT.reshape(B, K, nv, tv),
                     GYeT.reshape(B, K, nv, tv)], axis=3)                      # [B,K,nv,3,tv]
    ops = ops.reshape(B, K, 3 * V).astype(compute_dtype)

    # ---- layout: channels on sublanes, vertices on lanes ----
    featT = jnp.swapaxes(feat, -1, -2)                                         # [B, C, V] f32

    # ---- parameters (small; stage-2 weights in compute dtype, biases f32) ----
    A_reT = params["A_re"].T.astype(f32)
    A_imT = params["A_im"].T.astype(f32)
    A_x = jnp.concatenate([A_reT, A_reT], axis=0).astype(compute_dtype)        # [2C, C]
    A_y = jnp.concatenate([-A_imT, A_imT], axis=0).astype(compute_dtype)       # [2C, C]
    W0T = jnp.concatenate([params["W0a"], params["W0b"], params["W0c"]],
                          axis=0).T.astype(compute_dtype)                      # [H, 3C]
    b0T = params["b0"].reshape(H, 1).astype(f32)
    W1T = params["W1"].T.astype(compute_dtype)                                 # [C, H]
    b1T = params["b1"].reshape(C, 1).astype(f32)

    def param_spec(shape):
        return pl.BlockSpec(shape, lambda b, v: (0, 0))

    out_t = pl.pallas_call(
        diffusionnet_block_kernel,
        out_shape=jax.ShapeDtypeStruct((B, C, V), feat.dtype),
        grid=(B, nv),
        in_specs=[
            pl.BlockSpec((1, C, K), lambda b, v: (b, 0, 0)),       # diffused spectrum
            pl.BlockSpec((1, C, tv), lambda b, v: (b, 0, v)),      # feat^T tile
            pl.BlockSpec((1, K, 3 * tv), lambda b, v: (b, 0, v)),  # fused operator slab
            param_spec((2 * C, C)),       # A_x
            param_spec((2 * C, C)),       # A_y
            param_spec((H, 3 * C)),       # fused W0^T
            param_spec((H, 1)),           # b0
            param_spec((C, H)),           # W1^T
            param_spec((C, 1)),           # b1
        ],
        out_specs=pl.BlockSpec((1, C, tv), lambda b, v: (b, 0, v)),
        compiler_params=pltpu.CompilerParams(
            dimension_semantics=("parallel", "parallel"),
            vmem_limit_bytes=_vmem_limit_bytes()),
    )(spec, featT, ops, A_x, A_y, W0T, b0T, W1T, b1T)

    # TODO(synk): for production C >= 128, transpose to [tv, C] inside the kernel
    # (idle XLU slot) and drop this extra HBM round-trip.
    return jnp.swapaxes(out_t, -1, -2)   # back to [B, V, C]


def reference(feat, mass, evals, evecs, gradX, gradY, params):
    """Pure-JAX reference mirroring the PyTorch forward (eval mode)."""
    prec = jax.lax.Precision.HIGHEST
    t = jnp.maximum(params["diffusion_time"], 1e-8)
    xm = feat * mass[..., None]
    feat_spec = jnp.einsum("bvk,bvc->bkc", evecs, xm, precision=prec)
    coefs = jnp.exp(-evals[..., None] * t[None, None, :])
    feat_diffuse = jnp.einsum("bvk,bkc->bvc", evecs, coefs * feat_spec, precision=prec)
    fgx = jnp.einsum("bvw,bwc->bvc", gradX, feat_diffuse, precision=prec)
    fgy = jnp.einsum("bvw,bwc->bvc", gradY, feat_diffuse, precision=prec)
    re_b = (jnp.matmul(fgx, params["A_re"], precision=prec)
            - jnp.matmul(fgy, params["A_im"], precision=prec))
    im_b = (jnp.matmul(fgx, params["A_re"], precision=prec)
            + jnp.matmul(fgy, params["A_im"], precision=prec))
    feat_grad = jnp.tanh(fgx * re_b + fgy * im_b)
    comb = jnp.concatenate([feat, feat_diffuse, feat_grad], axis=-1)
    W0 = jnp.concatenate([params["W0a"], params["W0b"], params["W0c"]], axis=0)
    h = jnp.maximum(jnp.matmul(comb, W0, precision=prec) + params["b0"], 0.0)
    y = jnp.matmul(h, params["W1"], precision=prec) + params["b1"]
    return y + feat


if __name__ == "__main__":
    # Small, TPU-friendly shapes consistent with DiffusionNetBlock's forward.
    # V=256 with tv=128 exercises the vertex-tile grid axis (2 tiles per batch).
    B, V, K, C, H = 2, 256, 32, 16, 32

    key = jax.random.PRNGKey(0)
    keys = jax.random.split(key, 12)

    feat = jax.random.normal(keys[0], (B, V, C), jnp.float32)
    mass = jax.random.uniform(keys[1], (B, V), jnp.float32, 0.5, 1.5)
    evals = jax.random.uniform(keys[2], (B, K), jnp.float32, 0.0, 2.0)
    evecs = jax.random.normal(keys[3], (B, V, K), jnp.float32) / jnp.sqrt(V)
    gradX = jax.random.normal(keys[4], (B, V, V), jnp.float32) / jnp.sqrt(V)
    gradY = jax.random.normal(keys[5], (B, V, V), jnp.float32) / jnp.sqrt(V)

    # Parameters (deterministic synthetic init; shapes follow the module __init__).
    # Linear weights are stored pre-transposed as [in, out] so y = x @ W.
    params = {
        "diffusion_time": jnp.zeros((C,), jnp.float32),   # nn.init.constant_(..., 0.0)
        "A_re": 0.2 * jax.random.normal(keys[6], (C, C), jnp.float32),
        "A_im": 0.2 * jax.random.normal(keys[7], (C, C), jnp.float32),
        "W0a": 0.2 * jax.random.normal(keys[8], (C, H), jnp.float32),
        "W0b": 0.2 * jax.random.normal(keys[9], (C, H), jnp.float32),
        "W0c": 0.2 * jax.random.normal(keys[10], (C, H), jnp.float32),
        "b0": jnp.zeros((H,), jnp.float32),
        "W1": 0.2 * jax.random.normal(keys[11], (H, C), jnp.float32),
        "b1": jnp.zeros((C,), jnp.float32),
    }

    ref = jax.block_until_ready(
        reference(feat, mass, evals, evecs, gradX, gradY, params))

    # Exact-precision path: validates the kernel math against the reference.
    out_f32 = jax.block_until_ready(
        diffusionnet_block(feat, mass, evals, evecs, gradX, gradY, params,
                           compute_dtype=jnp.float32, tv=128))
    assert out_f32.shape == (B, V, C)
    assert jnp.allclose(out_f32, ref, rtol=1e-4, atol=1e-4), "f32 kernel mismatch"

    # Production path: bf16-streamed operands with f32 MXU accumulation.
    out_bf16 = jax.block_until_ready(
        diffusionnet_block(feat, mass, evals, evecs, gradX, gradY, params,
                           compute_dtype=jnp.bfloat16, tv=128))
    assert out_bf16.shape == (B, V, C)
    assert jnp.allclose(out_bf16, ref, rtol=1e-1, atol=1e-1), "bf16 kernel mismatch"

    print("KERNEL_OK")
</pallas_src>

<mosaic_0001>
module attributes {stable_mosaic.version = 11 : i64} {
  func.func @diffusionnet_block_kernel(%arg0: i32, %arg1: i32, %arg2: memref<1x16x32xf32, #tpu.memory_space<vmem>>, %arg3: memref<1x16x128xf32, #tpu.memory_space<vmem>>, %arg4: memref<1x32x384xf32, #tpu.memory_space<vmem>>, %arg5: memref<32x16xf32, #tpu.memory_space<vmem>>, %arg6: memref<32x16xf32, #tpu.memory_space<vmem>>, %arg7: memref<32x48xf32, #tpu.memory_space<vmem>>, %arg8: memref<32x1xf32, #tpu.memory_space<vmem>>, %arg9: memref<16x32xf32, #tpu.memory_space<vmem>>, %arg10: memref<16x1xf32, #tpu.memory_space<vmem>>, %arg11: memref<1x16x128xf32, #tpu.memory_space<vmem>>) attributes {dimension_semantics = [#tpu.dimension_semantics<parallel>, #tpu.dimension_semantics<parallel>], iteration_bounds = array<i64: 2, 2>, scalar_prefetch = 0 : i64, scratch_operands = 0 : i64, tpu.core_type = #tpu.core_type<tc>, window_params = [{transform_indices = @transform_0, window_bounds = array<i64: 1, 16, 32>}, {transform_indices = @transform_1, window_bounds = array<i64: 1, 16, 128>}, {transform_indices = @transform_2, window_bounds = array<i64: 1, 32, 384>}, {pipeline_mode = #tpu.pipeline_mode<synchronous>, transform_indices = @transform_3, window_bounds = array<i64: 32, 16>}, {pipeline_mode = #tpu.pipeline_mode<synchronous>, transform_indices = @transform_4, window_bounds = array<i64: 32, 16>}, {pipeline_mode = #tpu.pipeline_mode<synchronous>, transform_indices = @transform_5, window_bounds = array<i64: 32, 48>}, {pipeline_mode = #tpu.pipeline_mode<synchronous>, transform_indices = @transform_6, window_bounds = array<i64: 32, 1>}, {pipeline_mode = #tpu.pipeline_mode<synchronous>, transform_indices = @transform_7, window_bounds = array<i64: 16, 32>}, {pipeline_mode = #tpu.pipeline_mode<synchronous>, transform_indices = @transform_8, window_bounds = array<i64: 16, 1>}, {transform_indices = @transform_9, window_bounds = array<i64: 1, 16, 128>}]} {
    %c0 = arith.constant 0 : index
    %c0_0 = arith.constant 0 : index
    %c0_1 = arith.constant 0 : index
    %0 = vector.load %arg2[%c0, %c0_0, %c0_1] : memref<1x16x32xf32, #tpu.memory_space<vmem>>, vector<1x16x32xf32>
    %1 = vector.shape_cast %0 : vector<1x16x32xf32> to vector<16x32xf32>
    %c0_2 = arith.constant 0 : index
    %c0_3 = arith.constant 0 : index
    %c0_4 = arith.constant 0 : index
    %2 = vector.load %arg4[%c0_2, %c0_3, %c0_4] : memref<1x32x384xf32, #tpu.memory_space<vmem>>, vector<1x32x384xf32>
    %3 = vector.shape_cast %2 : vector<1x32x384xf32> to vector<32x384xf32>
    %cst = arith.constant dense<0.000000e+00> : vector<16x384xf32>
    %4 = tpu.matmul %1, %3, %cst {dimension_numbers = #tpu.dot_dimension_numbers<[1], [0], [0], [1], [0, 0, 1, 1], [], []>} : vector<16x32xf32>, vector<32x384xf32>, vector<16x384xf32> -> vector<16x384xf32>
    %5 = vector.extract_strided_slice %4 {offsets = [0, 0], sizes = [16, 128], strides = [1, 1]} : vector<16x384xf32> to vector<16x128xf32>
    %6 = vector.extract_strided_slice %4 {offsets = [0, 128], sizes = [16, 128], strides = [1, 1]} : vector<16x384xf32> to vector<16x128xf32>
    %7 = vector.extract_strided_slice %4 {offsets = [0, 256], sizes = [16, 128], strides = [1, 1]} : vector<16x384xf32> to vector<16x128xf32>
    %c0_5 = arith.constant 0 : index
    %c0_6 = arith.constant 0 : index
    %8 = vector.load %arg5[%c0_5, %c0_6] : memref<32x16xf32, #tpu.memory_space<vmem>>, vector<32x16xf32>
    %cst_7 = arith.constant dense<0.000000e+00> : vector<32x128xf32>
    %9 = tpu.matmul %8, %6, %cst_7 {dimension_numbers = #tpu.dot_dimension_numbers<[1], [0], [0], [1], [0, 0, 1, 1], [], []>} : vector<32x16xf32>, vector<16x128xf32>, vector<32x128xf32> -> vector<32x128xf32>
    %c0_8 = arith.constant 0 : index
    %c0_9 = arith.constant 0 : index
    %10 = vector.load %arg6[%c0_8, %c0_9] : memref<32x16xf32, #tpu.memory_space<vmem>>, vector<32x16xf32>
    %cst_10 = arith.constant dense<0.000000e+00> : vector<32x128xf32>
    %11 = tpu.matmul %10, %7, %cst_10 {dimension_numbers = #tpu.dot_dimension_numbers<[1], [0], [0], [1], [0, 0, 1, 1], [], []>} : vector<32x16xf32>, vector<16x128xf32>, vector<32x128xf32> -> vector<32x128xf32>
    %12 = arith.addf %9, %11 : vector<32x128xf32>
    %13 = vector.extract_strided_slice %12 {offsets = [0, 0], sizes = [16, 128], strides = [1, 1]} : vector<32x128xf32> to vector<16x128xf32>
    %14 = arith.mulf %6, %13 : vector<16x128xf32>
    %15 = vector.extract_strided_slice %12 {offsets = [16, 0], sizes = [16, 128], strides = [1, 1]} : vector<32x128xf32> to vector<16x128xf32>
    %16 = arith.mulf %7, %15 : vector<16x128xf32>
    %17 = arith.addf %14, %16 : vector<16x128xf32>
    %18 = math.tanh %17 : vector<16x128xf32>
    %c0_11 = arith.constant 0 : index
    %c0_12 = arith.constant 0 : index
    %c0_13 = arith.constant 0 : index
    %19 = vector.load %arg3[%c0_11, %c0_12, %c0_13] : memref<1x16x128xf32, #tpu.memory_space<vmem>>, vector<1x16x128xf32>
    %20 = vector.shape_cast %19 : vector<1x16x128xf32> to vector<16x128xf32>
    %21 = tpu.concatenate %20, %5, %18 in 0 : vector<16x128xf32>, vector<16x128xf32>, vector<16x128xf32> -> vector<48x128xf32>
    %c0_14 = arith.constant 0 : index
    %c0_15 = arith.constant 0 : index
    %22 = vector.load %arg7[%c0_14, %c0_15] : memref<32x48xf32, #tpu.memory_space<vmem>>, vector<32x48xf32>
    %cst_16 = arith.constant dense<0.000000e+00> : vector<32x128xf32>
    %23 = tpu.matmul %22, %21, %cst_16 {dimension_numbers = #tpu.dot_dimension_numbers<[1], [0], [0], [1], [0, 0, 1, 1], [], []>} : vector<32x48xf32>, vector<48x128xf32>, vector<32x128xf32> -> vector<32x128xf32>
    %c0_17 = arith.constant 0 : index
    %c0_18 = arith.constant 0 : index
    %24 = vector.load %arg8[%c0_17, %c0_18] : memref<32x1xf32, #tpu.memory_space<vmem>>, vector<32x1xf32>
    %25 = vector.broadcast %24 : vector<32x1xf32> to vector<32x128xf32>
    %26 = arith.addf %23, %25 : vector<32x128xf32>
    %cst_19 = arith.constant 0.000000e+00 : f32
    %27 = vector.broadcast %cst_19 : f32 to vector<32x128xf32>
    %28 = arith.maximumf %26, %27 : vector<32x128xf32>
    %c0_20 = arith.constant 0 : index
    %c0_21 = arith.constant 0 : index
    %29 = vector.load %arg9[%c0_20, %c0_21] : memref<16x32xf32, #tpu.memory_space<vmem>>, vector<16x32xf32>
    %cst_22 = arith.constant dense<0.000000e+00> : vector<16x128xf32>
    %30 = tpu.matmul %29, %28, %cst_22 {dimension_numbers = #tpu.dot_dimension_numbers<[1], [0], [0], [1], [0, 0, 1, 1], [], []>} : vector<16x32xf32>, vector<32x128xf32>, vector<16x128xf32> -> vector<16x128xf32>
    %c0_23 = arith.constant 0 : index
    %c0_24 = arith.constant 0 : index
    %31 = vector.load %arg10[%c0_23, %c0_24] : memref<16x1xf32, #tpu.memory_space<vmem>>, vector<16x1xf32>
    %32 = vector.broadcast %31 : vector<16x1xf32> to vector<16x128xf32>
    %33 = arith.addf %30, %32 : vector<16x128xf32>
    %34 = arith.addf %33, %20 : vector<16x128xf32>
    %c0_25 = arith.constant 0 : index
    %c0_26 = arith.constant 0 : index
    %c0_27 = arith.constant 0 : index
    %35 = vector.load %arg11[%c0_25, %c0_26, %c0_27] : memref<1x16x128xf32, #tpu.memory_space<vmem>>, vector<1x16x128xf32>
    %36 = vector.shape_cast %35 : vector<1x16x128xf32> to vector<16x128xf32>
    %37 = vector.shape_cast %34 : vector<16x128xf32> to vector<1x16x128xf32>
    tpu.vector_store %arg11[%c0_25, %c0_26, %c0_27], %37 {strides = array<i32>} : memref<1x16x128xf32, #tpu.memory_space<vmem>>, vector<1x16x128xf32>,
    return
  }
  func.func @transform_0(%arg0: i32, %arg1: i32) -> (i32, i32, i32) {
    %c0_i32 = arith.constant 0 : i32
    %c0_i32_0 = arith.constant 0 : i32
    %c0_i32_1 = arith.constant 0 : i32
    return %arg0, %c0_i32, %c0_i32_0 : i32, i32, i32
  }
  func.func @transform_1(%arg0: i32, %arg1: i32) -> (i32, i32, i32) {
    %c0_i32 = arith.constant 0 : i32
    %c0_i32_0 = arith.constant 0 : i32
    return %arg0, %c0_i32, %arg1 : i32, i32, i32
  }
  func.func @transform_2(%arg0: i32, %arg1: i32) -> (i32, i32, i32) {
    %c0_i32 = arith.constant 0 : i32
    %c0_i32_0 = arith.constant 0 : i32
    return %arg0, %c0_i32, %arg1 : i32, i32, i32
  }
  func.func @transform_3(%arg0: i32, %arg1: i32) -> (i32, i32) {
    %c0_i32 = arith.constant 0 : i32
    %c0_i32_0 = arith.constant 0 : i32
    %c0_i32_1 = arith.constant 0 : i32
    return %c0_i32, %c0_i32_0 : i32, i32
  }
  func.func @transform_4(%arg0: i32, %arg1: i32) -> (i32, i32) {
    %c0_i32 = arith.constant 0 : i32
    %c0_i32_0 = arith.constant 0 : i32
    %c0_i32_1 = arith.constant 0 : i32
    return %c0_i32, %c0_i32_0 : i32, i32
  }
  func.func @transform_5(%arg0: i32, %arg1: i32) -> (i32, i32) {
    %c0_i32 = arith.constant 0 : i32
    %c0_i32_0 = arith.constant 0 : i32
    %c0_i32_1 = arith.constant 0 : i32
    return %c0_i32, %c0_i32_0 : i32, i32
  }
  func.func @transform_6(%arg0: i32, %arg1: i32) -> (i32, i32) {
    %c0_i32 = arith.constant 0 : i32
    %c0_i32_0 = arith.constant 0 : i32
    %c0_i32_1 = arith.constant 0 : i32
    return %c0_i32, %c0_i32_0 : i32, i32
  }
  func.func @transform_7(%arg0: i32, %arg1: i32) -> (i32, i32) {
    %c0_i32 = arith.constant 0 : i32
    %c0_i32_0 = arith.constant 0 : i32
    %c0_i32_1 = arith.constant 0 : i32
    return %c0_i32, %c0_i32_0 : i32, i32
  }
  func.func @transform_8(%arg0: i32, %arg1: i32) -> (i32, i32) {
    %c0_i32 = arith.constant 0 : i32
    %c0_i32_0 = arith.constant 0 : i32
    %c0_i32_1 = arith.constant 0 : i32
    return %c0_i32, %c0_i32_0 : i32, i32
  }
  func.func @transform_9(%arg0: i32, %arg1: i32) -> (i32, i32, i32) {
    %c0_i32 = arith.constant 0 : i32
    %c0_i32_0 = arith.constant 0 : i32
    return %arg0, %c0_i32, %arg1 : i32, i32, i32
  }
}

</mosaic_0001>

<bundles_post_ra>
// kernel: tpu_custom_call.1
= control target key start
LH: loop header
LB: loop body
LE: loop exit
PB: predicated region body
PF: predicated region fallthrough
CT: control target
= control target key end

     0   :  { %s2777_s0 = inlined_call_operand.hbm [shape: f32[2,16,32], index: 0, kind: input, shape index: {}]   ;;  %s2778_s1 = inlined_call_operand.hbm [shape: f32[2,16,256], index: 1, kind: input, shape index: {}]   ;;  %s2779_s2 = inlined_call_operand.hbm [shape: f32[2,32,768], index: 2, kind: input, shape index: {}]   ;;  %s2780_s3 = inlined_call_operand.hbm [shape: f32[32,16], index: 3, kind: input, shape index: {}]   ;;  %s2781_s4 = inlined_call_operand.hbm [shape: f32[32,16], index: 4, kind: input, shape index: {}]   ;;  %s2782_s5 = inlined_call_operand.hbm [shape: f32[32,48], index: 5, kind: input, shape index: {}]   ;;  %s2783_s6 = inlined_call_operand.hbm [shape: f32[32,1], index: 6, kind: input, shape index: {}]   ;;  %s2784_s7 = inlined_call_operand.hbm [shape: f32[16,32], index: 7, kind: input, shape index: {}]   ;;  %s2785_s8 = inlined_call_operand.hbm [shape: f32[16,1], index: 8, kind: input, shape index: {}]   ;;  %s2786_s9 = inlined_call_operand.hbm [shape: f32[2,16,256], index: 9, kind: output, shape index: {}]  }
   0x1   :  { %2815 = sst [smem:[#allocation36_spill]] %s2777_s0 }
   0x2   :  { %2816 = sst [smem:[#allocation37_spill]] %s2778_s1 }
   0x3   :  { %2817 = sst [smem:[#allocation38_spill]] %s2779_s2 }
   0x4   :  { %2818 = sst [smem:[#allocation39_spill]] %s2780_s3 }
   0x5   :  { %2819 = sst [smem:[#allocation40_spill]] %s2782_s5 }
   0x6   :  { %2820 = sst [smem:[#allocation41_spill]] %s2784_s7 }
   0x7   :  { %2821 = sst [smem:[#allocation42_spill]] %s2786_s9 }
   0x8   :  { %14 = vsyncpa [#allocation3], 0 }
   0x9   :  { %16 = vsyncpa [#allocation3 + $0x1], 0 }
   0xa   :  { %17 = vsyncpa [#allocation6], 0 }
   0xb   :  { %19 = vsyncpa [#allocation6 + $0x1], 0 }
   0xc   :  { %20 = vsyncpa [#allocation9], 0 }
   0xd   :  { %21 = vsyncpa [#allocation12], 0 }
   0xe   :  { %22 = vsyncpa [#allocation15], 0 }
   0xf   :  { %23 = vsyncpa [#allocation4], 0 }
  0x10   :  { %25 = vsyncpa [#allocation4 + $0x1], 0  ;;  %s2213_s30 = smov 0   ;;  %s2215_s10 = smov 0  }
  0x11   :  { %s2217_s11 = smov 0   ;;  %s2219_s12 = smov 0  }
  0x12   :  { %s2221_s13 = smov 0   ;;  %s2223_s14 = smov 0  }
  0x13   :  { %s2225_s15 = smov 0   ;;  %s2227_s16 = smov 0  }
  0x14   :  { %s2229_s17 = smov 0   ;;  %s2231_s18 = smov 0  }
  0x15   :  { %s2233_s19 = smov 0  }
  0x16 LB: > { %2822 = sst [smem:[#allocation24_spill]] %s2100_s30  ;;  %s2269_s20 = sadd.s32 4294967295, %s2140_s19   ;;  %s2140_s19 = sphi %s2233_s19, %s31_s19   ;;  %s2136_s18 = sphi %s2231_s18, %s2894_s18   ;;  %s2132_s17 = sphi %s2229_s17, %s2893_s17   ;;  %s2128_s16 = sphi %s2227_s16, %s2892_s16   ;;  %s2124_s15 = sphi %s2225_s15, %s2891_s15   ;;  %s2120_s14 = sphi %s2223_s14, %s2890_s14   ;;  %s2116_s13 = sphi %s2221_s13, %s2889_s13   ;;  %s2112_s12 = sphi %s2219_s12, %s2884_s12   ;;  %s2108_s11 = sphi %s2217_s11, %s2883_s11   ;;  %s2104_s10 = sphi %s2215_s10, %s2888_s10   ;;  %s2100_s30 = sphi %s2213_s30, %s2887_s30  }
  0x17   : > { %2823 = sst [smem:[#allocation25_spill]] %s2108_s11  ;;  %p1360_p0 = scmp.ge.s32.totalorder %s2140_s19, 1 }
  0x18   : > { %2824 = sst [smem:[#allocation26_spill]] %s2112_s12  ;;  %p2792_p1 = scmp.eq.s32.totalorder %s2269_s20, 0 }
  0x19   : > { %2825 = sst [smem:[#allocation27_spill]] %s2116_s13  ;;  %p284_p2 = scmp.lt.s32.totalorder %s2140_s19, 5 }
  0x1a   : > { %2826 = sst [smem:[#allocation28_spill]] %s2124_s15  ;;  %s2142_s22 = smov [#allocation8]  }
  0x1b   : > { %2827 = sst [smem:[#allocation29_spill]] %s2128_s16  ;;  %p2274_p3 = pnand %p1360_p0, %p284_p2 }
  0x1c   : > { %s296_s23 = sshll.u32 %s2142_s22, 4  ;;  %s2143_s25 = smov [#allocation11]   ;;  %s2278_s23 = int_to_ptr.vmem [resolvable:$true] %s296_s23 }
  0x1d   : > { %s2828_s21 = scalar_select %p2274_p3, 1, 0 }
  0x1e   : > { %p1586_p4 = pneg %p2274_p3  ;;  %s322_s26 = sshll.u32 %s2143_s25, 4  ;;  %s2288_s26 = int_to_ptr.vmem [resolvable:$true] %s322_s26 }
  0x1f   : > { %2829 = sst [smem:[#allocation30_spill]] %s2828_s21  ;;  %s2144_s27 = smov [#allocation14]  }
  0x20   : > { %p2284_p5 = pnand %p1586_p4, %p2792_p1  ;;  %s2290_s28 = sshll.u32 %s2144_s27, 4  ;;  %s349_s28 = int_to_ptr.vmem [resolvable:$true] %s2290_s28 }
  0x21   : > { %s2831_s3 = sld [smem:[#allocation39_spill]] }
  0x22   : > { %s2830_s24 = scalar_select %p2284_p5, 1, 0 }
  0x23   : > { %p2300_p7 = pneg %p2284_p5 }
  0x27   : > { %s1744_s22 = scalar_lea.hbm %s2831_s3, 512 }
  0x28   : > { %p1745_p6 = scmp.ne.s32.totalorder %s2831_s3, %s1744_s22  ;;  %p1751_p10 = scmp.lt.u32.totalorder %s1744_s22, %s2831_s3 }
  0x2a   : > { %p1747_p8 = pnand %p2300_p7, %p1745_p6 }
  0x2c   : > { %p1748_p9 = pneg %p1747_p8 }
  0x2e   : > { %p1753_p11 = pnand %p1751_p10, %p1748_p9 }
  0x30   : > { %1756 = shalt.err (!%p1753_p11)
}
  0x31   : > { %s1757_s9 = scalar_lea.vmem %s2278_s23, 512  ;;  %p1765_p2 = scmp.lt.s32.totalorder %s2278_s23, %s2278_s23 }
  0x32   : > { %p1758_p12 = scmp.ne.s32.totalorder %s2278_s23, %s1757_s9  ;;  %p1766_p4 = scmp.lt.s32.totalorder %s1757_s9, %s1757_s9 }
  0x34   : > { %p1760_p13 = pnand %p1758_p12, %p2300_p7  ;;  %p1767_p6 = por %p1766_p4, %p1765_p2 }
  0x36   : > { %p1761_p0 = pneg %p1760_p13 }
  0x38   : > { %p1768_p8 = pnand %p1767_p6, %p1761_p0 }
  0x3a   : > { %1771 = shalt.err (!%p1768_p8)
}
  0x3b   : > { %s2794_s15 = smov 128   ;;  %s2796_s16 = smov 8  }
  0x3c   : > { %1589 = dma.hbm_to_vmem [thread:$0]  (!%p2284_p5), %s2831_s3, 512, %s2278_s23, [#allocation9], %s2794_s15, %s2794_s15, %s2796_s16  }
  0x3d   : > { %s2833_s5 = sld [smem:[#allocation40_spill]] }
  0x43   : > { %s1772_s9 = scalar_lea.hbm %s2833_s5, 512 }
  0x44   : > { %p1773_p9 = scmp.ne.s32.totalorder %s2833_s5, %s1772_s9  ;;  %p1779_p12 = scmp.lt.u32.totalorder %s1772_s9, %s2833_s5 }
  0x46   : > { %p1775_p10 = pnand %p1773_p9, %p2300_p7 }
  0x48   : > { %p1776_p11 = pneg %p1775_p10 }
  0x4a   : > { %p1781_p13 = pnand %p1779_p12, %p1776_p11 }
  0x4c   : > { %1784 = shalt.err (!%p1781_p13)
}
  0x4d   : > { %s1785_s23 = scalar_lea.vmem %s2288_s26, 512  ;;  %p1793_p6 = scmp.lt.s32.totalorder %s2288_s26, %s2288_s26 }
  0x4e   : > { %p1786_p0 = scmp.ne.s32.totalorder %s2288_s26, %s1785_s23  ;;  %p1794_p8 = scmp.lt.s32.totalorder %s1785_s23, %s1785_s23 }
  0x50   : > { %p1788_p2 = pnand %p1786_p0, %p2300_p7  ;;  %p1795_p9 = por %p1794_p8, %p1793_p6 }
  0x52   : > { %p1789_p4 = pneg %p1788_p2 }
  0x54   : > { %p1796_p10 = pnand %p1795_p9, %p1789_p4 }
  0x56   : > { %1799 = shalt.err (!%p1796_p10)
}
  0x57   : > { %1595 = dma.hbm_to_vmem [thread:$0]  (!%p2284_p5), %s2833_s5, 512, %s2288_s26, [#allocation12], %s2794_s15, %s2794_s15, %s2796_s16  }
  0x58   : > { %s2834_s7 = sld [smem:[#allocation41_spill]] }
  0x5e   : > { %s1800_s29 = scalar_lea.hbm %s2834_s7, 256 }
  0x5f   : > { %p1801_p11 = scmp.ne.s32.totalorder %s2834_s7, %s1800_s29  ;;  %p1807_p0 = scmp.lt.u32.totalorder %s1800_s29, %s2834_s7 }
  0x61   : > { %p1803_p12 = pnand %p1801_p11, %p2300_p7 }
  0x63   : > { %p1804_p13 = pneg %p1803_p12 }
  0x65   : > { %p1809_p2 = pnand %p1807_p0, %p1804_p13 }
  0x67   : > { %1812 = shalt.err (!%p1809_p2)
}
  0x68   : > { %s1813_s23 = scalar_lea.vmem %s349_s28, 256  ;;  %p1821_p9 = scmp.lt.s32.totalorder %s349_s28, %s349_s28 }
  0x69   : > { %p1814_p4 = scmp.ne.s32.totalorder %s349_s28, %s1813_s23  ;;  %p1822_p10 = scmp.lt.s32.totalorder %s1813_s23, %s1813_s23 }
  0x6b   : > { %p1816_p6 = pnand %p1814_p4, %p2300_p7  ;;  %p1823_p1 = por %p1822_p10, %p1821_p9 }
  0x6d   : > { %p1817_p8 = pneg %p1816_p6 }
  0x6f   : > { %p1824_p3 = pnand %p1823_p1, %p1817_p8 }
  0x71   : > { %1827 = shalt.err (!%p1824_p3)
}
  0x72   : > { %1601 = dma.hbm_to_vmem [thread:$0]  (!%p2284_p5), %s2834_s7, 256, %s349_s28, [#allocation15], %s2794_s15, %s2794_s15, %s2796_s16  }
  0x73   : > { %s1359_s2 = sadd.s32 4294967294, %s2140_s19   ;;  %s40_s12 = sadd.s32 1, %s2132_s17 }
  0x74   : > { %s43_s13 = sadd.s32 1, %s2136_s18  ;;  %p41_p1 = scmp.ge.s32.totalorder %s40_s12, 2 }
  0x75   : > { %p2806_p3 = scmp.eq.s32.totalorder %s2140_s19, 0  ;;  %s78_s29 = sadd.s32 1, %s2108_s11 }
  0x76   : > { %p85_p11 = scmp.ne.s32.totalorder %s2108_s11, %s2104_s10  ;;  %s2896_s12 = smov (%p41_p1, %s40_s12), 0 }
  0x77   : > { %2835 = sst [smem:[#allocation31_spill]] %s2896_s12  ;;  %s2898_s13 = smov (!%p41_p1, %s43_s13), %s2136_s18 }
  0x78   : > { %s74_s22 = ssub.s32 %s2132_s17, %s2896_s12  ;;  %p2386_p12 = por %p85_p11, %p2806_p3 }
  0x79   : > { %p45_p13 = scmp.ge.s32.totalorder %s2898_s13, 2  ;;  %p91_p0 = scmp.ne.s32.totalorder %s2104_s10, %s2100_s30 }
  0x7a   : > { %p271_p2 = scmp.eq.s32.totalorder %s2269_s20, 3  ;;  %p277_p4 = scmp.eq.s32.totalorder %s1359_s2, 3 }
  0x7b   : > { %s2900_s13 = smov (%p45_p13, %s2898_s13), 0  ;;  %p2838_p6 = scmp.eq.s32.totalorder %s2269_s20, 0 }
  0x7c   : > { %2837 = sst [smem:[#allocation32_spill]] %s2900_s13  ;;  %p2401_p9 = por %p271_p2, %p85_p11 }
  0x7d   : > { %p2397_p8 = por %p91_p0, %p2838_p6  ;;  %s2407_s9 = ssub.s32 %s2136_s18, %s2900_s13 }
  0x7e   : > { %s2841_s27 = scalar_select %p2401_p9, 1, 0 }
  0x7f   : > { %s2839_s25 = scalar_select %p2397_p8, 1, 0 }
  0x80   : > { %2842 = sst [smem:[#allocation34_spill]] %s2841_s27  ;;  %p2409_p10 = por %p277_p4, %p91_p0 }
  0x81   : > { %2840 = sst [smem:[#allocation33_spill]] %s2839_s25  ;;  %s75_s26 = sor.u32 %s74_s22, %s2407_s9 }
  0x82   : > { %s2843_s23 = scalar_select %p2409_p10, 1, 0 }
  0x83   : > { %p2805_p1 = scmp.lt.s32.totalorder %s2140_s19, 4  ;;  %p76_p13 = scmp.eq.s32.totalorder %s75_s26, 0 }
  0x84   : > { %s396_s0 = sand.u32 1, %s2140_s19   ;;  %s398_s2 = sand.u32 1, %s2108_s11  }
  0x85   : > { %s2418_s15 = scalar_select %p76_p13, %s2108_s11, %s78_s29  }
  0x86   : > { %s1371_s16 = sshll.u32 %s398_s2, 4  ;;  %s1372_s3 = sshll.u32 %s2136_s18, 2 }
  0x87   : > { %2844 = sst [smem:[#allocation35_spill]] %s2418_s15  ;;  %s405_s5 = sadd.s32 %s2132_s17, %s1372_s3 }
  0x88   : > { %s1373_s7 = sshll.u32 %s405_s5, 7  ;;  %s400_s13 = scalar_lea.vmem [#allocation5], %s1371_s16 }
  0x89   : > { %s408_s12 = sshll.u32 %s400_s13, 4  ;;  %s2845_s1 = sld [smem:[#allocation37_spill]]  ;;  %s2427_s12 = int_to_ptr.vmem [resolvable:$true] %s408_s12 }
  0x8a   : > { %p2433_p11 = pnand %p2805_p1, %p2386_p12  ;;  %s2437_s3 = smul.u32 96, %s398_s2 }
  0x8b   : > { %s2147_s5 = smov [#allocation10]  }
  0x8c   : > { %s2846_s29 = scalar_select %p2433_p11, 1, 0 }
  0x8d   : > { %s2439_s30 = sshll.u32 %s2147_s5, 4  ;;  %p2812_p2 = pneg %p2433_p11  ;;  %s310_s30 = int_to_ptr.vmem [resolvable:$true] %s2439_s30 }
  0x8f   : > { %s2425_s25 = scalar_lea.hbm %s2845_s1, %s1373_s7  ;;  %s2441_s7 = scalar_lea.sflag [#allocation6], %s396_s0 }
  0x90   : > { %s1828_s16 = scalar_lea.hbm %s2425_s25, 256  ;;  %s1833_s28 = scalar_lea.hbm %s2845_s1, 1024 }
  0x91   : > { %p1829_p0 = scmp.ne.s32.totalorder %s2425_s25, %s1828_s16  ;;  %p1834_p6 = scmp.lt.u32.totalorder %s2425_s25, %s2845_s1 }
  0x92   : > { %p1835_p13 = scmp.lt.u32.totalorder %s1833_s28, %s1828_s16  ;;  %p1837_p3 = scmp.lt.u32.totalorder %s1828_s16, %s2425_s25 }
  0x93   : > { %p1831_p4 = pnand %p2812_p2, %p1829_p0 }
  0x94   : > { %p1836_p1 = por %p1835_p13, %p1834_p6 }
  0x95   : > { %p1832_p12 = pneg %p1831_p4 }
  0x96   : > { %p1838_p10 = por %p1837_p3, %p1836_p1 }
  0x98   : > { %p1839_p9 = pnand %p1838_p10, %p1832_p12 }
  0x9a   : > { %1842 = shalt.err (!%p1839_p9)
}
  0x9b   : > { %s1843_s0 = scalar_lea.vmem %s2427_s12, 256  ;;  %s2148_s2 = smov [#allocation5]  }
  0x9c   : > { %p1844_p0 = scmp.ne.s32.totalorder %s2427_s12, %s1843_s0  ;;  %s1848_s5 = sshll.u32 %s2148_s2, 4  ;;  %s1849_s5 = int_to_ptr.vmem [resolvable:$false] %s1848_s5 }
  0x9d   : > { %s1850_s13 = scalar_lea.vmem %s1849_s5, 512  ;;  %p1851_p5 = scmp.lt.s32.totalorder %s2427_s12, %s1849_s5 }
  0x9e   : > { %p1846_p4 = pnand %p1844_p0, %p2812_p2  ;;  %p1852_p6 = scmp.lt.s32.totalorder %s1850_s13, %s1843_s0 }
  0xa0   : > { %p1847_p8 = pneg %p1846_p4  ;;  %p1853_p13 = por %p1852_p6, %p1851_p5 }
  0xa2   : > { %p1854_p3 = pnand %p1853_p13, %p1847_p8 }
  0xa4   : > { %1857 = shalt.err (!%p1854_p3)
}
  0xa5   : > { %s2149_s16 = smov 256   ;;  %s2847_s22 = smov 8  }
  0xa6   : > { %s2848_s28 = smov 128   ;;  %s422_s27 = scalar_lea.vmem [#allocation7], %s2437_s3 }
  0xa7   : > { %1611 = dma.hbm_to_vmem [thread:$0]  (!%p2433_p11), %s2425_s25, 256, %s2427_s12, %s2441_s7, %s2149_s16, %s2848_s28, %s2847_s22  }
  0xa8   : > { %s2473_s26 = sshll.u32 %s422_s27, 4  ;;  %s1858_s5 = scalar_lea.hbm %s2781_s4, 512  ;;  %s2604_s26 = int_to_ptr.vmem [resolvable:$true] %s2473_s26 }
  0xa9   : > { %p1859_p5 = scmp.ne.s32.totalorder %s2781_s4, %s1858_s5  ;;  %p1865_p10 = scmp.lt.u32.totalorder %s1858_s5, %s2781_s4 }
  0xab   : > { %p1861_p8 = pnand %p1859_p5, %p2300_p7 }
  0xad   : > { %p1862_p9 = pneg %p1861_p8 }
  0xaf   : > { %p1867_p1 = pnand %p1865_p10, %p1862_p9 }
  0xb1   : > { %1870 = shalt.err (!%p1867_p1)
}
  0xb2   : > { %s1871_s12 = scalar_lea.vmem %s310_s30, 512  ;;  %p1879_p6 = scmp.lt.s32.totalorder %s310_s30, %s310_s30 }
  0xb3   : > { %p1872_p12 = scmp.ne.s32.totalorder %s310_s30, %s1871_s12  ;;  %p1880_p13 = scmp.lt.s32.totalorder %s1871_s12, %s1871_s12 }
  0xb5   : > { %p1874_p0 = pnand %p1872_p12, %p2300_p7  ;;  %p1881_p3 = por %p1880_p13, %p1879_p6 }
  0xb7   : > { %p1875_p4 = pneg %p1874_p0 }
  0xb9   : > { %p1882_p2 = pnand %p1881_p3, %p1875_p4 }
  0xbb   : > { %1885 = shalt.err (!%p1882_p2)
}
  0xbc   : > { %p2849_p5 = scmp.ne.s32.totalorder %s2830_s24, 0  ;;  %s2150_s15 = smov [#allocation13]  }
  0xbd   : > { %s335_s25 = sshll.u32 %s2150_s15, 4  ;;  %s2151_s3 = smov [#allocation16]   ;;  %s336_s25 = int_to_ptr.vmem [resolvable:$true] %s335_s25 }
  0xbe   : > { %1592 = dma.hbm_to_vmem [thread:$0]  (!%p2849_p5), %s2781_s4, 512, %s310_s30, [#allocation9], %s2848_s28, %s2848_s28, %s2847_s22  }
  0xbf   : > { %s361_s16 = sshll.u32 %s2151_s3, 4  ;;  %s1886_s2 = scalar_lea.hbm %s2783_s6, 512  ;;  %s362_s16 = int_to_ptr.vmem [resolvable:$true] %s361_s16 }
  0xc0   : > { %p1887_p2 = scmp.ne.s32.totalorder %s2783_s6, %s1886_s2  ;;  %p1893_p10 = scmp.lt.u32.totalorder %s1886_s2, %s2783_s6 }
  0xc2   : > { %p1889_p8 = pnand %p1887_p2, %p2300_p7 }
  0xc4   : > { %p1890_p9 = pneg %p1889_p8 }
  0xc6   : > { %p1895_p1 = pnand %p1893_p10, %p1890_p9 }
  0xc8   : > { %1898 = shalt.err (!%p1895_p1)
}
  0xc9   : > { %s1899_s30 = scalar_lea.vmem %s336_s25, 512  ;;  %p1907_p6 = scmp.lt.s32.totalorder %s336_s25, %s336_s25 }
  0xca   : > { %p1900_p12 = scmp.ne.s32.totalorder %s336_s25, %s1899_s30  ;;  %p1908_p13 = scmp.lt.s32.totalorder %s1899_s30, %s1899_s30 }
  0xcc   : > { %p1902_p0 = pnand %p1900_p12, %p2300_p7  ;;  %p1909_p3 = por %p1908_p13, %p1907_p6 }
  0xce   : > { %p1903_p4 = pneg %p1902_p0 }
  0xd0   : > { %p1910_p11 = pnand %p1909_p3, %p1903_p4 }
  0xd2   : > { %1913 = shalt.err (!%p1910_p11)
}
  0xd3   : > { %1598 = dma.hbm_to_vmem [thread:$0]  (!%p2849_p5), %s2783_s6, 512, %s336_s25, [#allocation12], %s2848_s28, %s2848_s28, %s2847_s22  }
  0xd4   : > { %s1914_s0 = scalar_lea.hbm %s2785_s8, 256 }
  0xd5   : > { %p1915_p2 = scmp.ne.s32.totalorder %s2785_s8, %s1914_s0  ;;  %p1921_p9 = scmp.lt.u32.totalorder %s1914_s0, %s2785_s8 }
  0xd7   : > { %p1917_p11 = pnand %p1915_p2, %p2300_p7 }
  0xd9   : > { %p1918_p8 = pneg %p1917_p11 }
  0xdb   : > { %p1923_p10 = pnand %p1921_p9, %p1918_p8 }
  0xdd   : > { %1926 = shalt.err (!%p1923_p10)
}
  0xde   : > { %s1927_s1 = scalar_lea.vmem %s362_s16, 256  ;;  %p1935_p4 = scmp.lt.s32.totalorder %s362_s16, %s362_s16 }
  0xdf   : > { %p1928_p1 = scmp.ne.s32.totalorder %s362_s16, %s1927_s1  ;;  %p1936_p6 = scmp.lt.s32.totalorder %s1927_s1, %s1927_s1 }
  0xe1   : > { %p1930_p12 = pnand %p1928_p1, %p2300_p7  ;;  %p1937_p13 = por %p1936_p6, %p1935_p4 }
  0xe3   : > { %p1931_p0 = pneg %p1930_p12 }
  0xe5   : > { %p1938_p3 = pnand %p1937_p13, %p1931_p0 }
  0xe7   : > { %1941 = shalt.err (!%p1938_p3)
}
  0xe8   : > { %s2850_s11 = sld [smem:[#allocation27_spill]]  ;;  %s2851_s21 = sld [smem:[#allocation26_spill]] }
  0xe9   : > { %1604 = dma.hbm_to_vmem [thread:$0]  (!%p2849_p5), %s2785_s8, 256, %s362_s16, [#allocation15], %s2848_s28, %s2848_s28, %s2847_s22  }
  0xea   : > { %p48_p7 = scmp.eq.s32.totalorder %s2407_s9, 0  ;;  %s50_s24 = sadd.s32 1, %s2120_s14 }
  0xeb   : > { %p2852_p11 = scmp.eq.s32.totalorder %s2140_s19, 0  ;;  %s375_s3 = sand.u32 1, %s2120_s14  }
  0xec   : > { %s2543_s15 = scalar_select %p48_p7, %s2120_s14, %s50_s24  }
  0xed   : > { %s1408_s27 = sshll.u32 %s2136_s18, 8  ;;  %p2853_p10 = scmp.eq.s32.totalorder %s2269_s20, 0 }
  0xee   : > { %p57_p2 = scmp.ne.s32.totalorder %s2120_s14, %s2850_s11  ;;  %p63_p9 = scmp.ne.s32.totalorder %s2850_s11, %s2851_s21 }
  0xef   : > { %s1368_s2 = sshll.u32 %s375_s3, 4  ;;  %s2855_s12 = sld [smem:[#allocation36_spill]] }
  0xf0   : > { %p59_p8 = por %p2852_p11, %p57_p2  ;;  %p2553_p1 = por %p2853_p10, %p63_p9 }
  0xf1   : > { %p2857_p5 = scmp.lt.s32.totalorder %s2140_s19, 4  ;;  %s379_s25 = scalar_lea.vmem [#allocation2], %s1368_s2 }
  0xf2   : > { %s386_s30 = sshll.u32 %s379_s25, 4  ;;  %s423_s11 = smul.u32 3, %s2132_s17  ;;  %s2569_s30 = int_to_ptr.vmem [resolvable:$true] %s386_s30 }
  0xf3   : > { %p2564_p12 = pnand %p2857_p5, %p59_p8  ;;  %s2571_s21 = scalar_lea.sflag [#allocation3], %s375_s3 }
  0xf5   : > { %s2856_s1 = smov %s2855_s12  ;;  %s2560_s16 = scalar_lea.hbm %s2855_s12, %s1408_s27 }
  0xf6   : > { %s1942_s24 = scalar_lea.hbm %s2560_s16, 256  ;;  %p1944_p4 = pneg %p2564_p12 }
  0xf7   : > { %p1943_p0 = scmp.ne.s32.totalorder %s2560_s16, %s1942_s24  ;;  %s1947_s13 = scalar_lea.hbm %s2856_s1, 512 }
  0xf8   : > { %p1948_p3 = scmp.lt.u32.totalorder %s2560_s16, %s2856_s1  ;;  %p1949_p7 = scmp.lt.u32.totalorder %s1947_s13, %s1942_s24 }
  0xf9   : > { %p1945_p6 = pnand %p1944_p4, %p1943_p0  ;;  %p1951_p11 = scmp.lt.u32.totalorder %s1942_s24, %s2560_s16 }
  0xfa   : > { %p1950_p2 = por %p1949_p7, %p1948_p3 }
  0xfb   : > { %p1946_p13 = pneg %p1945_p6 }
  0xfc   : > { %p1952_p8 = por %p1951_p11, %p1950_p2 }
  0xfe   : > { %p1953_p9 = pnand %p1952_p8, %p1946_p13 }
 0x100   : > { %1956 = shalt.err (!%p1953_p9)
}
 0x101   : > { %s1957_s3 = scalar_lea.vmem %s2569_s30, 256  ;;  %s2152_s25 = smov [#allocation2]  }
 0x102   : > { %p1958_p10 = scmp.ne.s32.totalorder %s2569_s30, %s1957_s3  ;;  %s1962_s27 = sshll.u32 %s2152_s25, 4  ;;  %s1963_s27 = int_to_ptr.vmem [resolvable:$false] %s1962_s27 }
 0x103   : > { %s1964_s5 = scalar_lea.vmem %s1963_s27, 512  ;;  %p1965_p6 = scmp.lt.s32.totalorder %s2569_s30, %s1963_s27 }
 0x104   : > { %p1960_p5 = pnand %p1958_p10, %p1944_p4  ;;  %p1966_p3 = scmp.lt.s32.totalorder %s1964_s5, %s1957_s3 }
 0x106   : > { %p1961_p0 = pneg %p1960_p5  ;;  %p1967_p7 = por %p1966_p3, %p1965_p6 }
 0x108   : > { %p1968_p2 = pnand %p1967_p7, %p1961_p0 }
 0x10a   : > { %1971 = shalt.err (!%p1968_p2)
}
 0x10b   : > { %1608 = dma.hbm_to_vmem [thread:$0]  (!%p2564_p12), %s2560_s16, 256, %s2569_s30, %s2571_s21, %s2848_s28, %s2848_s28, %s2847_s22  }
 0x10c   : > { %s1552_s24 = smul.u32 24, %s2136_s18  ;;  %s2859_s9 = sld [smem:[#allocation38_spill]] }
 0x10d   : > { %p2860_p13 = scmp.ne.s32.totalorder %s2846_s29, 0 }
 0x10e   : > { %s428_s13 = sadd.s32 %s1552_s24, %s423_s11 }
 0x10f   : > { %s1374_s12 = sshll.u32 %s428_s13, 7  ;;  %p2861_p11 = pneg %p2860_p13 }
 0x112   : > { %s2611_s25 = scalar_lea.hbm %s2859_s9, %s1374_s12  ;;  %s1977_s16 = scalar_lea.hbm %s2859_s9, 6144 }
 0x113   : > { %s1972_s27 = scalar_lea.hbm %s2611_s25, 1536  ;;  %p1978_p9 = scmp.lt.u32.totalorder %s2611_s25, %s2859_s9 }
 0x114   : > { %p1973_p4 = scmp.ne.s32.totalorder %s2611_s25, %s1972_s27  ;;  %p1979_p10 = scmp.lt.u32.totalorder %s1977_s16, %s1972_s27 }
 0x115   : > { %p1981_p0 = scmp.lt.u32.totalorder %s1972_s27, %s2611_s25 }
 0x116   : > { %p1975_p12 = pnand %p1973_p4, %p2861_p11  ;;  %p1980_p5 = por %p1979_p10, %p1978_p9 }
 0x118   : > { %p1976_p8 = pneg %p1975_p12  ;;  %p1982_p6 = por %p1981_p0, %p1980_p5 }
 0x11a   : > { %p1983_p3 = pnand %p1982_p6, %p1976_p8 }
 0x11c   : > { %1986 = shalt.err (!%p1983_p3)
}
 0x11d   : > { %s1987_s21 = scalar_lea.vmem %s2604_s26, 1536  ;;  %p2862_p2 = pmov %p2861_p11 }
 0x11e   : > { %p1988_p7 = scmp.ne.s32.totalorder %s2604_s26, %s1987_s21  ;;  %s2153_s5 = smov [#allocation7]  }
 0x11f   : > { %s1992_s24 = sshll.u32 %s2153_s5, 4  ;;  %s1993_s24 = int_to_ptr.vmem [resolvable:$false] %s1992_s24 }
 0x120   : > { %p1990_p4 = pnand %p1988_p7, %p2862_p2  ;;  %s1994_s13 = scalar_lea.vmem %s1993_s24, 3072 }
 0x121   : > { %p1995_p12 = scmp.lt.s32.totalorder %s2604_s26, %s1993_s24  ;;  %p1996_p9 = scmp.lt.s32.totalorder %s1994_s13, %s1987_s21 }
 0x122   : > { %p1991_p11 = pneg %p1990_p4 }
 0x123   : > { %p1997_p10 = por %p1996_p9, %p1995_p12 }
 0x125   : > { %p1998_p5 = pnand %p1997_p10, %p1991_p11 }
 0x127   : > { %2001 = shalt.err (!%p1998_p5)
}
 0x128   : > { %s2154_s12 = smov 768   ;;  %s2155_s2 = smov 384  }
 0x129   : > { %s2156_s3 = smov 24   ;;  %s2863_s27 = sld [smem:[#allocation30_spill]] }
 0x12a   : > { %1614 = dma.hbm_to_vmem [thread:$0]  (!%p2860_p13), %s2611_s25, 1536, %s2604_s26, %s2441_s7, %s2154_s12, %s2155_s2, %s2156_s3  }
 0x12f   : > { %p2864_p8 = scmp.ne.s32.totalorder %s2863_s27, 0 }
 0x130   : > { %s2865_s22 = sld [smem:[#allocation27_spill]] (!%p2864_p8) }
 0x131   : > { %443 = sbr.rel (%p2864_p8) target bundleno = 1272 (0x4f8), region = 56 }
 0x136   : > { %s445_s28 = sand.u32 (!%p2864_p8), 1, %s2865_s22  }
 0x137   : > { %s2640_s16 = sshll.u32 (!%p2864_p8), %s445_s28, 4  ;;  %s446_s30 = scalar_lea.sflag (!%p2864_p8), [#allocation3], %s445_s28 }
 0x138   : > { %s449_s11 = scalar_lea.vmem [#allocation2], %s2640_s16 }
 0x139   : > { %2075 = dma.done.wait (%p2553_p1), %s446_s30, 256  }
 0x13a   : > { %2077 = vsyncadd (%p2553_p1), %s446_s30, 4294967040  ;;  %s2866_s29 = sld [smem:[#allocation33_spill]]  ;;  %s454_s7 = sand.u32 1, %s2269_s20  }
 0x13b   : > { %s2649_s26 = sand.u32 1, %s2104_s10   ;;  %s455_s21 = scalar_lea.sflag [#allocation6], %s454_s7 }
 0x13c   : > { %s1377_s25 = sshll.u32 %s2649_s26, 4 }
 0x13d   : > { %s2654_s5 = scalar_lea.vmem [#allocation5], %s1377_s25 }
 0x140   : > { %p2867_p13 = scmp.ne.s32.totalorder %s2866_s29, 0 }
 0x142   : > { %2079 = dma.done.wait (%p2867_p13), %s455_s21, 1792  }
 0x143   : > { %2081 = vsyncadd (%p2867_p13), %s455_s21, 4294965504  ;;  %s1553_s0 = smul.u32 96, %s2649_s26  ;;  %p2868_p1 = scmp.eq.s32.totalorder %s2269_s20, 0 }
 0x145   : > { %s467_s24 = scalar_lea.vmem [#allocation7], %s1553_s0 }
 0x146   : > { %2083 = dma.done.wait (%p2868_p1), [#allocation9], 1024   ;;  %p2869_p0 = pmov %p2868_p1 }
 0x148   : > { %2085 = vsyncadd (%p2869_p0), [#allocation9], 4294966272  ;;  %p2870_p6 = pmov %p2869_p0 }
 0x149   : > { %p2871_p3 = pmov %p2869_p0 }
 0x14a   : > { %2087 = dma.done.wait (%p2870_p6), [#allocation12], 1024  }
 0x14b   : > { %2089 = vsyncadd (%p2871_p3), [#allocation12], 4294966272  ;;  %p2872_p7 = pmov %p2869_p0 }
 0x14c   : > { %p2873_p2 = pmov %p2869_p0 }
 0x14d   : > { %2091 = dma.done.wait (%p2872_p7), [#allocation15], 512  }
 0x14e   : > { %2093 = vsyncadd (%p2873_p2), [#allocation15], 4294966784  ;;  %v2157_v0 = vmov 0.0   ;;  %v540_v1 = vld [vmem:[%s467_s24 + $0x8] sm:$0xff]  ;;  %v543_v2 = vld [vmem:[%s467_s24 + $0x20] sm:$0xff]  ;;  %vm551_vm0 = vcmask 261120  }
 0x14f   : > { %622 = vmatprep.mubr.f32.mxu0 %v2157_v0  ;;  %v541_v3 = vld [vmem:[%s467_s24 + $0x10] sm:$0xff]  ;;  %v1503_v4 = vpack.c.bf16 %v543_v2, %v540_v1  ;;  %v544_v5 = vld [vmem:[%s467_s24 + $0x28] sm:$0xff]  ;;  %v539_v6 = vld [vmem:[%s467_s24] sm:$0xff]  ;;  %vm718_vm1 = vcmask 130048   ;;  %vm951_vm2 = vcmask 392192   ;;  %v2158_v44 = vmov 0  }
 0x150   : > { %v542_v7 = vld [vmem:[%s467_s24 + $0x18] sm:$0xff]  ;;  %v1511_v8 = vpack.c.bf16 %v544_v5, %v541_v3  ;;  %v549_v11 = vld [vmem:[%s467_s24 + $0x50] sm:$0xff]  ;;  %v547_v12 = vld [vmem:[%s467_s24 + $0x40] sm:$0xff]  ;;  %1738 = vset.pattern.permute.xlu0 %v2158_v44  ;;  %1739 = vset.pattern.permute.xlu1 %v2158_v44  ;;  %s2874_s20 = sld [smem:[#allocation29_spill]]  ;;  %s2875_s13 = sld [smem:[#allocation28_spill]] }
 0x151   : > { %v1505_v9 = vpack.c.bf16 %v542_v7, %v539_v6  ;;  %v546_v10 = vld [vmem:[%s467_s24 + $0x38] sm:$0xff]  ;;  %1504 = vmatprep.subr.bf16.mxu0 %v1503_v4  ;;  %v545_v15 = vld [vmem:[%s467_s24 + $0x30] sm:$0xff]  ;;  %v548_v16 = vld [vmem:[%s467_s24 + $0x48] sm:$0xff]  ;;  %s535_s3 = scalar_lea.vmem [#allocation17], %s1377_s25  ;;  %s2876_s22 = sld [smem:[#allocation34_spill]] }
 0x152   : > { %v1507_v13 = vpack.c.bf16 %v549_v11, %v546_v10  ;;  %v550_v14 = vld [vmem:[%s467_s24 + $0x58] sm:$0xff]  ;;  %1512 = vmatprep.subr.bf16.mxu1 %v1511_v8  ;;  %v1509_v18 = vpack.c.bf16 %v548_v16, %v545_v15  ;;  %v537_v19 = vld [vmem:[%s449_s11] sm:$0xff]  ;;  %v715_v34 = vld [vmem:[#allocation10 + $0x8] sm:$0xff]  ;;  %s1167_s27 = sshll.u32 %s535_s3, 4  ;;  %s1153_s25 = scalar_lea.sflag [#allocation4], %s2649_s26  ;;  %s2707_s27 = int_to_ptr.vmem [resolvable:$true] %s1167_s27 }
 0x153   : > { %1506 = vmatpush1.bf16.msra.mxu0 %v1505_v9  ;;  %v1515_v17 = vpack.c.bf16 %v550_v14, %v547_v12  ;;  %1514 = vmatpush3.bf16.msra.mxu1 %v1511_v8  ;;  %v538_v20 = vld [vmem:[%s449_s11 + $0x8] sm:$0xff]  ;;  %v2682_v21 = vld [vmem:[%s2654_s5] sm:$0xff]  ;;  %s2877_s11 = sld [smem:[#allocation42_spill]]  ;;  %s2002_s21 = scalar_lea.vmem %s2707_s27, 256 }
 0x154   : > { %1508 = vmatprep.subr.bf16.mxu0 %v1507_v13  ;;  %1451 = vmatprep.mubr.msk.f32.mxu1 %vm551_vm0, %v537_v19  ;;  %v2685_v22 = vld [vmem:[%s2654_s5 + $0x8] sm:$0xff]  ;;  %v714_v24 = vld [vmem:[#allocation10] sm:$0xff]  ;;  %v716_v35 = vld [vmem:[#allocation10 + $0x10] sm:$0xff]  ;;  %p2003_p4 = scmp.ne.s32.totalorder %s2707_s27, %s2002_s21  ;;  %s2159_s5 = smov [#allocation17]  }
 0x155   : > { %1516 = vmatprep.subr.bf16.mxu1 %v1515_v17  ;;  %v1527_v23 = vpack.c.bf16 %v2685_v22, %v2682_v21  ;;  %v717_v36 = vld [vmem:[#allocation10 + $0x18] sm:$0xff]  ;;  %v710_v37 = vld [vmem:[#allocation8] sm:$0xff]  ;;  %v711_v38 = vld [vmem:[#allocation8 + $0x8] sm:$0xff]  ;;  %s2006_s0 = sshll.u32 %s2159_s5, 4  ;;  %s2007_s0 = int_to_ptr.vmem [resolvable:$false] %s2006_s0 }
 0x156   : > { %v712_v39 = vld [vmem:[#allocation8 + $0x10] sm:$0xff]  ;;  %v713_v40 = vld [vmem:[#allocation8 + $0x18] sm:$0xff]  ;;  %v923_v41 = vld [vmem:[#allocation11] sm:$0xff]  ;;  %s1404_s12 = sshll.u32 %s2874_s20, 2  ;;  %s2008_s24 = scalar_lea.vmem %s2007_s0, 512 }
 0x157   : > { %1510 = vmatpush1.bf16.msra.mxu0 %v1509_v18  ;;  %1518 = vmatpush3.bf16.msra.mxu1 %v1515_v17  ;;  %v927_v42 = vld [vmem:[#allocation13] sm:$0xff]  ;;  %v929_v43 = vld [vmem:[#allocation13 + $0x10] sm:$0xff]  ;;  %v928_v45 = vld [vmem:[#allocation13 + $0x8] sm:$0xff]  ;;  %s1164_s2 = sadd.s32 %s2875_s13, %s1404_s12  ;;  %p2879_p11 = scmp.ne.s32.totalorder %s2876_s22, 0 }
 0x158   : > { %1528 = vmatprep.subr.bf16.mxu0 %v1527_v23  ;;  %933 = vperm.xlu0 %1738, %v927_v42   ;;  %v930_v46 = vld [vmem:[#allocation13 + $0x18] sm:$0xff]  ;;  %v1055_v47 = vld [vmem:[#allocation16] sm:$0xff]  ;;  %v924_v62 = vld [vmem:[#allocation11 + $0x8] sm:$0xff]  ;;  %s1405_s28 = sshll.u32 %s1164_s2, 7  ;;  %p2009_p10 = scmp.lt.s32.totalorder %s2707_s27, %s2007_s0 }
 0x159   : > { %943 = vperm.xlu1 %1739, %v929_v43   ;;  %v1056_v48 = vld [vmem:[#allocation16 + $0x8] sm:$0xff]  ;;  %v925_v63 = vld [vmem:[#allocation11 + $0x10] sm:$0xff]  ;;  %v1053_v1 = vld [vmem:[#allocation14] sm:$0xff]  ;;  %s2878_s29 = smov %s2877_s11  ;;  %s2713_s7 = scalar_lea.hbm %s2877_s11, %s1405_s28 }
 0x15a   : > { %1385 = vmatmul.mubr.msk.f32.vlgmr.msra.gmra.mrb[0].mxu0 %vm551_vm0, %v537_v19  ;;  %1452 = vmatmul.mubr.msk.f32.vlgmr.msra.gmra.mrb[0].mxu1 %vm551_vm0, %v538_v20  ;;  %p2004_p12 = pnand %p2003_p4, %p2879_p11  ;;  %p2010_p5 = scmp.lt.s32.totalorder %s2008_s24, %s2002_s21 }
 0x15b   : > { %628 = vmatprep.mubr.f32.mxu0 %v2157_v0  ;;  %1530 = vmatpush3.bf16.msra.mxu0 %v1527_v23  ;;  %v926_v0 = vld [vmem:[#allocation11 + $0x18] sm:$0xff] }
 0x15c   : > { %1458 = vmatprep.mubr.msk.f32.mxu1 %vm718_vm1, %v714_v24  ;;  %938 = vperm.xlu0 %1738, %v928_v45   ;;  %p2005_p9 = pneg %p2004_p12  ;;  %p2011_p8 = por %p2010_p5, %p2009_p10 }
 0x15d   : > { %948 = vperm.xlu1 %1739, %v930_v46  }
 0x15e   : > { %1386 = vmatmul.mubr.msk.f32.gmra.mrb[2].mxu0 %vm551_vm0, %v538_v20  ;;  %v1054_v20 = vld [vmem:[#allocation14 + $0x8] sm:$0xff]  ;;  %p2012_p13 = pnand %p2011_p8, %p2005_p9 }
 0x15f   : > { %1486 = vmatprep.mubr.msk.f32.mxu0 %vm951_vm2, %v923_v41 }
 0x160   : > { %1059 = vperm.xlu0 %1738, %v1055_v47  }
 0x161   : > { %1064 = vperm.xlu1 %1739, %v1056_v48  }
 0x1d7   : > { %v934_v2 = vpop.permute.xlu0 %933 }
 0x1d8   : > { %v944_v3 = vpop.permute.xlu1 %943 }
 0x1db   : > { %v939_v4 = vpop.permute.xlu0 %938 }
 0x1dc   : > { %v949_v10 = vpop.permute.xlu1 %948 }
 0x1e0   : > { %v1065_v23 = vpop.permute.xlu1 %1064 }
 0x22d   : > { %v624_v25 = vpop.f32.mrb[0].mxu0  ;;  %v1453_v26 = vpop.f32.mrb[0].mxu1 }
 0x22e   : > { %v626_v27 = vpop.f32.mrb[1].mxu0  ;;  %v701_v28 = vpop.f32.mrb[1].mxu1 }
 0x22f   : > { %v1519_v29 = vpack.c.bf16 %v1453_v26, %v701_v28 }
 0x231   : > { %v630_v30 = vpop.f32.mrb[2].mxu0  ;;  %1520 = vmatprep.subr.bf16.mxu1 %v1519_v29 }
 0x232   : > { %v1531_v31 = vpack.c.bf16 %v630_v30, %v624_v25  ;;  %v632_v32 = vpop.f32.mrb[3].mxu0  ;;  %1522 = vmatpush3.bf16.msra.mxu1 %v1519_v29  ;;  %v1060_v25 = vpop.permute.xlu0 %1059 }
 0x233   : > { %v1523_v33 = vpack.c.bf16 %v632_v32, %v626_v27 }
 0x234   : > { %1532 = vmatprep.subr.bf16.mxu0 %v1531_v31 }
 0x235   : > { %1524 = vmatprep.subr.bf16.mxu1 %v1523_v33  ;;  %1534 = vmatpush3.bf16.msra.mxu0 %v1531_v31 }
 0x236   : > { %1459 = vmatmul.mubr.msk.f32.vlgmr.msra.gmra.mrb[2].mxu1 %vm718_vm1, %v715_v34 }
 0x237   : > { %1526 = vmatpush3.bf16.msra.mxu1 %v1523_v33  ;;  %1461 = vmatprep.mubr.msk.f32.mxu1 %vm718_vm1, %v716_v35 }
 0x23a   : > { %1462 = vmatmul.mubr.msk.f32.gmra.mrb[4].mxu1 %vm718_vm1, %v717_v36 }
 0x23b   : > { %1468 = vmatprep.mubr.msk.f32.mxu1 %vm718_vm1, %v710_v37 }
 0x23e   : > { %1469 = vmatmul.mubr.msk.f32.vlgmr.msra.gmra.mrb[2].mxu1 %vm718_vm1, %v711_v38 }
 0x23f   : > { %1471 = vmatprep.mubr.msk.f32.mxu1 %vm718_vm1, %v712_v39 }
 0x242   : > { %1472 = vmatmul.mubr.msk.f32.gmra.mrb[4].mxu1 %vm718_vm1, %v713_v40 }
 0x311   : > { %v1470_v49 = vpop.f32.mrb[2].mxu1 }
 0x312   : > { %v914_v50 = vmul.f32 %v1470_v49, %v632_v32  ;;  %v894_v51 = vpop.f32.mrb[3].mxu1 }
 0x313   : > { %v913_v52 = vmul.f32 %v894_v51, %v626_v27 }
 0x315   : > { %v1473_v53 = vpop.f32.mrb[4].mxu1 }
 0x316   : > { %v916_v54 = vmul.f32 %v1473_v53, %v1453_v26  ;;  %v904_v55 = vpop.f32.mrb[5].mxu1 }
 0x317   : > { %v915_v56 = vmul.f32 %v904_v55, %v701_v28 }
 0x318   : > { %v918_v57 = vadd.f32 %v916_v54, %v914_v50 }
 0x319   : > { %v917_v58 = vadd.f32 %v915_v56, %v913_v52 }
 0x31a   : > { %1740 = vtanh.f32 %v918_v57 }
 0x31b   : > { %1742 = vtanh.f32 %v917_v58 }
 0x324   : > { %v1741_v59 = vpop.eup %1740 }
 0x325   : > { %v1743_v60 = vpop.eup %1742 }
 0x326   : > { %v1535_v61 = vpack.c.bf16 %v1741_v59, %v1743_v60 }
 0x328   : > { %1536 = vmatprep.subr.bf16.mxu0 %v1535_v61 }
 0x329   : > { %1538 = vmatpush3.bf16.msra.mxu0 %v1535_v61 }
 0x32c   : > { %1487 = vmatmul.mubr.msk.f32.vlgmr.msra.gmra.mrb[4].mxu0 %vm951_vm2, %v924_v62 }
 0x32d   : > { %1489 = vmatprep.mubr.msk.f32.mxu0 %vm951_vm2, %v925_v63 }
 0x330   : > { %1490 = vmatmul.mubr.msk.f32.gmra.mrb[6].mxu0 %vm951_vm2, %v926_v0 }
 0x331   : > { %1500 = vmatprep.mubr.msk.f32.mxu0 %vm551_vm0, %v1053_v1 }
 0x3ff   : > { %v1488_v5 = vpop.f32.mrb[4].mxu0 }
 0x400   : > { %v1036_v6 = vadd.f32 %v1488_v5, %v939_v4  ;;  %v1030_v7 = vpop.f32.mrb[5].mxu0 }
 0x401   : > { %v1031_v8 = vadd.f32 %v1030_v7, %v934_v2 }
 0x402   : > { %v1050_v9 = vmax.f32 %v1036_v6, 0.0 }
 0x403   : > { %v1049_v11 = vmax.f32 %v1031_v8, 0.0  ;;  %v1491_v12 = vpop.f32.mrb[6].mxu0 }
 0x404   : > { %v1046_v13 = vadd.f32 %v1491_v12, %v949_v10  ;;  %v1040_v14 = vpop.f32.mrb[7].mxu0 }
 0x405   : > { %v1539_v15 = vpack.c.bf16 %v1050_v9, %v1049_v11  ;;  %v1041_v16 = vadd.f32 %v1040_v14, %v944_v3 }
 0x406   : > { %v1052_v17 = vmax.f32 %v1046_v13, 0.0 }
 0x407   : > { %v1051_v18 = vmax.f32 %v1041_v16, 0.0  ;;  %1540 = vmatprep.subr.bf16.mxu0 %v1539_v15 }
 0x408   : > { %1542 = vmatpush3.bf16.msra.mxu0 %v1539_v15 }
 0x409   : > { %v1543_v19 = vpack.c.bf16 %v1052_v17, %v1051_v18 }
 0x40b   : > { %1544 = vmatprep.subr.bf16.mxu0 %v1543_v19 }
 0x40c   : > { %1546 = vmatpush3.bf16.msra.mxu0 %v1543_v19 }
 0x40f   : > { %1501 = vmatmul.mubr.msk.f32.vlgmr.msra.gmra.mrb[8].mxu0 %vm551_vm0, %v1054_v20 }
 0x4e2   : > { %v1502_v24 = vpop.f32.mrb[8].mxu0 }
 0x4e3   : > { %v1145_v26 = vadd.f32 %v1502_v24, %v1065_v23  ;;  %v1139_v27 = vpop.f32.mrb[9].mxu0 }
 0x4e4   : > { %v1140_v28 = vadd.f32 %v1139_v27, %v1060_v25 }
 0x4e5   : > { %v1149_v29 = vadd.f32 %v1145_v26, %v2685_v22 }
 0x4e6   : > { %v1148_v30 = vadd.f32 %v1140_v28, %v2682_v21 }
 0x4e7   : > { %1151 = vst [vmem:[%s535_s3 + $0x8] sm:$0xff] %v1149_v29 }
 0x4e8   : > { %1150 = vst [vmem:[%s535_s3] sm:$0xff] %v1148_v30 }
 0x4e9   : > { %2015 = shalt.err (!%p2012_p13)
}
 0x4ea   : > { %s2016_s20 = scalar_lea.hbm %s2713_s7, 256  ;;  %s2020_s2 = scalar_lea.hbm %s2878_s29, 1024 }
 0x4eb   : > { %p2017_p1 = scmp.ne.s32.totalorder %s2713_s7, %s2016_s20  ;;  %p2021_p3 = scmp.lt.u32.totalorder %s2713_s7, %s2878_s29 }
 0x4ec   : > { %p2022_p7 = scmp.lt.u32.totalorder %s2020_s2, %s2016_s20  ;;  %p2024_p4 = scmp.lt.u32.totalorder %s2016_s20, %s2713_s7 }
 0x4ed   : > { %p2018_p0 = pnand %p2017_p1, %p2879_p11 }
 0x4ee   : > { %p2023_p2 = por %p2022_p7, %p2021_p3 }
 0x4ef   : > { %p2019_p6 = pneg %p2018_p0 }
 0x4f0   : > { %p2025_p12 = por %p2024_p4, %p2023_p2 }
 0x4f2   : > { %p2026_p9 = pnand %p2025_p12, %p2019_p6 }
 0x4f4   : > { %2029 = shalt.err (!%p2026_p9)
}
 0x4f5   : > { %s2160_s16 = smov 128   ;;  %s2161_s30 = smov 256  }
 0x4f6   : > { %s2162_s11 = smov 8  }
 0x4f7   : > { %1584 = dma.vmem_to_hbm [thread:$0]  (%p2879_p11), %s2707_s27, 256, %s2713_s7, %s1153_s25, %s2160_s16, %s2161_s30, %s2162_s11  }
 0x4f8 PF: > { %s2880_s21 = sld [smem:[#allocation24_spill]]  ;;  %p1632_p10 = scmp.ge.s32.totalorder %s2140_s19, 2 }
 0x4f9   : > { %p2881_p5 = scmp.ne.s32.totalorder %s2843_s23, 0 }
 0x4fb   : > { %p1616_p8 = pnand %p1632_p10, %p2881_p5 }
 0x4fe   : > { %s1182_s5 = sand.u32 1, %s2880_s21  }
 0x4ff   : > { %s1183_s0 = scalar_lea.sflag [#allocation4], %s1182_s5 }
 0x500   : > { %2095 = dma.done.wait (!%p1616_p8), %s1183_s0, 256  }
 0x501   : > { %2097 = vsyncadd (!%p1616_p8), %s1183_s0, 4294967040  ;;  %s31_s19 = sadd.s32 1, %s2140_s19   ;;  %s2882_s24 = sld [smem:[#allocation25_spill]] }
 0x502   : > { %p28_p13 = scmp.ge.s32.totalorder %s31_s19, 6   ;;  %s2883_s11 = sld [smem:[#allocation35_spill]] }
 0x503   : > { %s2884_s12 = sld [smem:[#allocation27_spill]]  ;;  %s2885_s26 = sld [smem:[#allocation31_spill]] }
 0x504   : > { %s2886_s27 = sld [smem:[#allocation32_spill]]  ;;  %s2887_s30 = smov %s2104_s10 }
 0x505   : > { %s2889_s13 = smov %s2120_s14  ;;  %s2890_s14 = smov %s2543_s15 }
 0x506   : > { %s2891_s15 = smov %s2132_s17  ;;  %s2892_s16 = smov %s2136_s18 }
 0x507   : > { %s2888_s10 = smov %s2882_s24  ;;  %30 = sbr.rel (!%p28_p13) target bundleno = 22 (0x16), region = 149 }
 0x509   : > { %s2893_s17 = smov %s2885_s26 }
 0x50a   : > { %s2894_s18 = smov %s2886_s27 }
 0x50e   :  { %1188 = vsyncpa [#allocation3], 1 }
 0x50f   :  { %1190 = vsyncpa [#allocation3 + $0x1], 1 }
 0x510   :  { %1191 = vsyncpa [#allocation6], 1 }
 0x511   :  { %1193 = vsyncpa [#allocation6 + $0x1], 1 }
 0x512   :  { %1194 = vsyncpa [#allocation9], 1 }
 0x513   :  { %1195 = vsyncpa [#allocation12], 1 }
 0x514   :  { %1196 = vsyncpa [#allocation15], 1 }
 0x515   :  { %1197 = vsyncpa [#allocation4], 1 }
 0x516   :  { %1199 = vsyncpa [#allocation4 + $0x1], 1 }

</bundles_post_ra>
